<compile_context>
chip_gen: v6e
topology: v6e:2x2x1
jax: 0.10.0
libtpu: 0.0.40
codegen_flags: <defaults>
</compile_context>

<pallas_src>
import numpy as np
import jax
import jax.numpy as jnp
from jax.experimental import pallas as pl
from jax.experimental.pallas import tpu as pltpu


# ---------------------------------------------------------------------------
# VMEM sizing helpers
# ---------------------------------------------------------------------------

def _round_up(v, m):
    return -(-v // m) * m


def _sublane_multiple(dtype):
    # f32 -> 8, bf16 -> 16, int8/bool -> 32 (packed sublanes).
    return 8 * (4 // max(1, jnp.dtype(dtype).itemsize))


def _vmem_params():
    """Returns (soft S-tile budget bytes, vmem_limit_bytes) per TPU generation."""
    vmem_cap = None
    try:
        info = pltpu.get_tpu_info()
        vmem_cap = getattr(info, "vmem_capacity_bytes", None)
    except Exception:
        vmem_cap = None
    if vmem_cap is None or vmem_cap <= 64 * 1024 * 1024:
        # v7x-class (64 MiB per TC) or unknown backend: stay conservative.
        return 6 * 1024 * 1024, 32 * 1024 * 1024
    # v5e / v6e (128 MiB): bigger tiles amortize the ~0.35 us per-grid-step cost.
    return 14 * 1024 * 1024, 64 * 1024 * 1024


def _tile_footprint_bytes(th, w_out, c_out, c_in, T, s_dtype, x_dtype):
    """Conservative padded-layout VMEM footprint for one grid step (with the
    double-buffered pipeline pair, the in-kernel f32 upcast temp and the
    resident output block)."""
    lanes = _round_up(w_out, 128)
    s_item = jnp.dtype(s_dtype).itemsize
    x_item = jnp.dtype(x_dtype).itemsize
    s_rows = _round_up(th, _sublane_multiple(s_dtype))
    x_rows = _round_up(th, _sublane_multiple(x_dtype))
    f_rows = _round_up(th, 8)

    s_tile = c_out * s_rows * lanes * s_item          # one S pipeline buffer (native)
    x_tile = c_in * x_rows * lanes * x_item           # one x pipeline buffer
    s_f32 = c_out * f_rows * lanes * 4                # in-kernel f32 upcast / read temp
    temps = (3 + (c_out if c_in > 1 else 0)) * f_rows * lanes * 4
    out_blk = _round_up(2 * T, 8) * lanes * 4

    return 2 * s_tile + 2 * x_tile + s_f32 + temps + 2 * out_blk


def _s_tile_bytes(th, w_out, c_out, s_dtype):
    lanes = _round_up(w_out, 128)
    rows = _round_up(th, _sublane_multiple(s_dtype))
    return c_out * rows * lanes * jnp.dtype(s_dtype).itemsize


def _choose_lane_fold(H, W):
    """Smallest divisor g of H such that g*W >= 128 (lane-dense rows); g=1 if W is
    already lane-dense, g=H as a last resort for tiny images."""
    if W >= 128:
        return 1
    for g in range(1, H + 1):
        if H % g == 0 and g * W >= 128:
            return g
    return H


def _choose_h_tile(h_fold, fits):
    """Largest chunk of folded rows (multiple of 8, or h_fold itself) that fits the
    VMEM budget; smallest candidate as a best-effort fallback."""
    cands = sorted({h_fold, *[d for d in range(8, h_fold + 1, 8) if h_fold % d == 0]},
                   reverse=True)
    for th in cands:
        if fits(th):
            return th
    return cands[-1]


# ---------------------------------------------------------------------------
# Kernel
# ---------------------------------------------------------------------------

def _encoder_loss_kernel(x_ref, s_ref, out_ref):
    """Per (b, h_chunk, t) grid step.

    x_ref:   (C_in,  TH, W_out)   -- resident across the whole t axis
    s_ref:   (C_out, TH, W_out)   -- native dtype, upcast here
    out_ref: (2*T,  W_out)        -- resident across the whole t axis; row 2t is
                                     sum_{c,rows} S, row 2t+1 is sum_{c,rows} x*S
    """
    t = pl.program_id(2)
    c_in = x_ref.shape[0]

    s = s_ref[...].astype(jnp.float32)                    # per-tile upcast (no-op if f32)
    s_csum = jnp.sum(s, axis=0)                           # (TH, W_out) sum over channels

    if c_in == 1:
        # sum_c (x * S_c) == x * sum_c S_c  -> one multiply total.
        xs_rows = x_ref[0].astype(jnp.float32) * s_csum
    else:
        xs_rows = jnp.sum(x_ref[...].astype(jnp.float32) * s, axis=0)

    out_ref[pl.ds(2 * t, 1), :] = jnp.sum(s_csum, axis=0, keepdims=True)
    out_ref[pl.ds(2 * t + 1, 1), :] = jnp.sum(xs_rows, axis=0, keepdims=True)


def _run_kernel(x_r, s_r, h_tile, vmem_limit):
    B, T, C_out, H_f, W_out = s_r.shape
    _, C_in, _, _ = x_r.shape
    n_h = H_f // h_tile

    out_shape = jax.ShapeDtypeStruct((B, n_h, 2 * T, W_out), jnp.float32)

    in_specs = [
        # x block index ignores t -> resident across all T steps of an (b, h) pair.
        pl.BlockSpec((None, C_in, h_tile, W_out), lambda b, h, t: (b, 0, h, 0)),
        pl.BlockSpec((None, None, C_out, h_tile, W_out),
                     lambda b, h, t: (b, t, 0, h, 0)),
    ]
    # Output block index is constant over t -> one resident block per (b, h),
    # written back to HBM once per (b, h) group (t axis is "arbitrary").
    out_specs = pl.BlockSpec((None, None, 2 * T, W_out), lambda b, h, t: (b, h, 0, 0))

    cost = pl.CostEstimate(
        flops=3 * int(s_r.size),
        transcendentals=0,
        bytes_accessed=int(s_r.size) * s_r.dtype.itemsize
        + int(x_r.size) * x_r.dtype.itemsize                   # x read once (resident over t)
        + B * n_h * 2 * T * W_out * 4,
    )

    return pl.pallas_call(
        _encoder_loss_kernel,
        out_shape=out_shape,
        grid=(B, n_h, T),
        in_specs=in_specs,
        out_specs=out_specs,
        compiler_params=pltpu.CompilerParams(
            dimension_semantics=("parallel", "parallel", "arbitrary"),
            vmem_limit_bytes=vmem_limit),
        cost_estimate=cost,
    )(x_r, s_r)


# ---------------------------------------------------------------------------
# Wrapper (forward pass of EncoderLossImages)
# ---------------------------------------------------------------------------

def _mutual_information_plain(X, Z):
    eps = jnp.float32(1e-12)
    joint = jnp.mean(X * Z)
    px = jnp.mean(X)
    pz = jnp.mean(Z)
    joint = jnp.maximum(joint, eps)
    px = jnp.maximum(px, eps)
    pz = jnp.maximum(pz, eps)
    return joint * jnp.log2(joint / (px * pz))


def encoder_loss_images(preds, x, *, h_tile=None):
    """Pallas implementation of EncoderLossImages.forward.

    h_tile (optional) is the chunk of *folded* rows per grid step.
    """
    S, Z1, Z2 = preds
    B, T, C_out, H, W = S.shape
    Bx, C_in, H_in, W_in = x.shape
    assert (H, W) == (H_in, W_in), 'Spatial dimensions of x and W must match.'
    assert C_in == 1 or C_in == C_out, (
        'x*Z broadcasting (as in the torch module) requires C_in == 1 or C_in == C_out.')

    # --- lane folding (free contiguous reshape): (H, W) -> (H/g, g*W) ---
    g = _choose_lane_fold(H, W)
    H_f, W_out = H // g, g * W
    S_r = S.reshape(B, T, C_out, H_f, W_out)      # native dtype, no copy
    x_r = x.reshape(B, C_in, H_f, W_out)

    soft_budget, vmem_limit = _vmem_params()
    if h_tile is None:
        def fits(th):
            return (_tile_footprint_bytes(th, W_out, C_out, C_in, T, S.dtype, x.dtype)
                    <= int(0.85 * vmem_limit)
                    and _s_tile_bytes(th, W_out, C_out, S.dtype) <= soft_budget)
        h_tile = _choose_h_tile(H_f, fits)
    assert H_f % h_tile == 0, 'h_tile must divide the folded row count.'
    assert h_tile == H_f or h_tile % 8 == 0, 'h_tile must be a multiple of 8 or full.'
    n_h = H_f // h_tile

    out = _run_kernel(x_r, S_r, h_tile, vmem_limit)          # (B, n_h, 2*T, W_out)
    out = out.reshape(B, n_h, T, 2, g, W)
    nsp_part = out[:, :, :, 0]                               # (B, n_h, T, g, W)
    xs_part = out[:, :, :, 1]

    # n_spikes[b, t, w] = sum over (C_out, H) of S  == torch.sum(S, dim=(2, 3))
    n_spikes = jnp.sum(nsp_part, axis=(1, 3))                # (B, T, W)

    # Time weights (t+1) applied to per-t partial sums (no S*w temp anywhere).
    tw = jnp.arange(1, T + 1, dtype=jnp.float32)
    sz = jnp.sum(jnp.sum(nsp_part, axis=(0, 1, 3, 4)) * tw)  # sum(Z)
    sxz = jnp.sum(jnp.sum(xs_part, axis=(0, 1, 3, 4)) * tw)  # sum(x * Z)

    # x-only reductions are tiny -> plain JAX.
    x32 = x.astype(jnp.float32)
    sx = jnp.sum(x32)
    area_x = jnp.sum(x32, axis=(2, 3))                       # (B, C_in)

    # --- mutual information (scalar epilogue, glue) ---
    eps = jnp.float32(1e-12)
    z_shape = (B, C_out, H, W)
    joint_cnt = float(np.prod(np.broadcast_shapes((B, C_in, H, W), z_shape)))
    joint = jnp.maximum(sxz / joint_cnt, eps)
    px = jnp.maximum(sx / float(x.size), eps)
    pz = jnp.maximum(sz / float(np.prod(z_shape)), eps)
    mi = joint * jnp.log2(joint / (px * pz))

    mi_Z1, mi_Z2 = 0.0, 0.0
    # TODO(synk): optional Z1/Z2 MI branch kept in plain JAX (rare path, only active
    # when their shape equals S.shape); the hot path over S goes through the kernel.
    if Z1 is not None and Z1.shape == S.shape:
        mi_Z1 = _mutual_information_plain(x32, Z1.astype(jnp.float32))
    if Z2 is not None and Z2.shape == S.shape:
        mi_Z2 = _mutual_information_plain(x32, Z2.astype(jnp.float32))

    # Same (odd) right-aligned broadcast as torch: (B,T,W) vs (B,C_in).
    L_S = jnp.abs(n_spikes - area_x)

    MI = mi
    cnt = 1
    if Z1 is not None:
        MI = MI + mi_Z1
        cnt += 1
    if Z2 is not None:
        MI = MI + mi_Z2
        cnt += 2   # mirrored from the source module (cnt += 2 for Z2, as written)

    return -(MI / cnt) + jnp.mean(L_S)


# ---------------------------------------------------------------------------
# Pure-JAX reference (mirrors the PyTorch module, computed in f32)
# ---------------------------------------------------------------------------

def reference_loss(preds, x):
    S, Z1, Z2 = preds
    S = S.astype(jnp.float32)
    x = x.astype(jnp.float32)
    B, T, C_out, H, W = S.shape
    weights = jnp.arange(1, T + 1, dtype=jnp.float32).reshape(T, 1, 1, 1)
    Sw = jnp.sum(S * weights, axis=1)
    mi = _mutual_information_plain(x, Sw)
    mi_Z1, mi_Z2 = 0.0, 0.0
    if Z1 is not None and Z1.shape == S.shape:
        mi_Z1 = _mutual_information_plain(x, Z1.astype(jnp.float32))
    if Z2 is not None and Z2.shape == S.shape:
        mi_Z2 = _mutual_information_plain(x, Z2.astype(jnp.float32))
    area_x = jnp.sum(x, axis=(2, 3))
    n_spikes = jnp.sum(S, axis=(2, 3))
    L_S = jnp.abs(n_spikes - area_x)
    MI = mi
    cnt = 1
    if Z1 is not None:
        MI = MI + mi_Z1
        cnt += 1
    if Z2 is not None:
        MI = MI + mi_Z2
        cnt += 2
    return -(MI / cnt) + jnp.mean(L_S)


if __name__ == "__main__":
    key = jax.random.PRNGKey(0)
    k1, k2, k3, k4 = jax.random.split(key, 4)

    # Test 1: small image, f32 spikes, lane-folding path (W=16 -> W_out=128).
    # Shapes chosen so the torch module's L_S broadcast (B,T,W) vs (B,C_in) is valid.
    B, T, C_in, C_out, H, W = 2, 2, 1, 4, 16, 16
    x = jax.random.uniform(k1, (B, C_in, H, W), dtype=jnp.float32)
    S = (jax.random.uniform(k2, (B, T, C_out, H, W), dtype=jnp.float32) > 0.7
         ).astype(jnp.float32)
    preds = (S, None, None)

    loss = jax.block_until_ready(encoder_loss_images(preds, x))
    ref = jax.block_until_ready(reference_loss(preds, x))
    assert np.allclose(np.asarray(loss), np.asarray(ref), rtol=1e-4, atol=1e-5), (loss, ref)

    # Test 2: bf16 spikes (native-dtype path, in-kernel upcast) with forced row
    # chunking (H=128 -> H_fold=16, h_tile=8 -> n_h=2).
    B2, T2, C_in2, C_out2, H2, W2 = 2, 2, 1, 4, 128, 16
    x2 = jax.random.uniform(k3, (B2, C_in2, H2, W2), dtype=jnp.float32)
    S2 = (jax.random.uniform(k4, (B2, T2, C_out2, H2, W2), dtype=jnp.float32) > 0.6
          ).astype(jnp.bfloat16)
    preds2 = (S2, None, None)

    loss2 = jax.block_until_ready(encoder_loss_images(preds2, x2, h_tile=8))
    ref2 = jax.block_until_ready(reference_loss(preds2, x2))
    assert np.allclose(np.asarray(loss2), np.asarray(ref2), rtol=1e-4, atol=1e-5), (loss2, ref2)

    print("KERNEL_OK")
</pallas_src>

<mosaic_0001>
module attributes {stable_mosaic.version = 11 : i64} {
  func.func @_encoder_loss_kernel(%arg0: i32, %arg1: i32, %arg2: i32, %arg3: memref<1x1x2x128xf32, #tpu.memory_space<vmem>>, %arg4: memref<1x1x4x2x128xf32, #tpu.memory_space<vmem>>, %arg5: memref<1x1x4x128xf32, #tpu.memory_space<vmem>>) attributes {dimension_semantics = [#tpu.dimension_semantics<parallel>, #tpu.dimension_semantics<parallel>, #tpu.dimension_semantics<arbitrary>], iteration_bounds = array<i64: 2, 1, 2>, scalar_prefetch = 0 : i64, scratch_operands = 0 : i64, tpu.core_type = #tpu.core_type<tc>, window_params = [{transform_indices = @transform_0, window_bounds = array<i64: 1, 1, 2, 128>}, {transform_indices = @transform_1, window_bounds = array<i64: 1, 1, 4, 2, 128>}, {transform_indices = @transform_2, window_bounds = array<i64: 1, 1, 4, 128>}]} {
    %c0 = arith.constant 0 : index
    %c0_0 = arith.constant 0 : index
    %c0_1 = arith.constant 0 : index
    %c0_2 = arith.constant 0 : index
    %c0_3 = arith.constant 0 : index
    %0 = vector.load %arg4[%c0, %c0_0, %c0_1, %c0_2, %c0_3] : memref<1x1x4x2x128xf32, #tpu.memory_space<vmem>>, vector<1x1x4x2x128xf32>
    %1 = vector.shape_cast %0 : vector<1x1x4x2x128xf32> to vector<4x2x128xf32>
    %cst = arith.constant dense<0.000000e+00> : vector<2x128xf32>
    %2 = vector.multi_reduction <add>, %1, %cst [0] : vector<4x2x128xf32> to vector<2x128xf32>
    %c0_4 = arith.constant 0 : index
    %c0_5 = arith.constant 0 : index
    %c0_6 = arith.constant 0 : index
    %c0_7 = arith.constant 0 : index
    %3 = vector.load %arg3[%c0_4, %c0_5, %c0_6, %c0_7] : memref<1x1x2x128xf32, #tpu.memory_space<vmem>>, vector<1x1x2x128xf32>
    %4 = vector.shape_cast %3 : vector<1x1x2x128xf32> to vector<2x128xf32>
    %5 = arith.mulf %4, %2 : vector<2x128xf32>
    %cst_8 = arith.constant dense<0.000000e+00> : vector<128xf32>
    %6 = vector.multi_reduction <add>, %2, %cst_8 [0] : vector<2x128xf32> to vector<128xf32>
    %7 = vector.shape_cast %6 : vector<128xf32> to vector<1x128xf32>
    %c2_i32 = arith.constant 2 : i32
    %8 = arith.muli %c2_i32, %arg2 : i32
    %c0_9 = arith.constant 0 : index
    %c0_10 = arith.constant 0 : index
    %9 = arith.index_cast %8 : i32 to index
    %c0_11 = arith.constant 0 : index
    %10 = vector.load %arg5[%c0_9, %c0_10, %9, %c0_11] : memref<1x1x4x128xf32, #tpu.memory_space<vmem>>, vector<1x1x1x128xf32>
    %11 = vector.shape_cast %10 : vector<1x1x1x128xf32> to vector<1x128xf32>
    %12 = vector.shape_cast %7 : vector<1x128xf32> to vector<1x1x1x128xf32>
    tpu.vector_store %arg5[%c0_9, %c0_10, %9, %c0_11], %12 {strides = array<i32>} : memref<1x1x4x128xf32, #tpu.memory_space<vmem>>, vector<1x1x1x128xf32>,
    %cst_12 = arith.constant dense<0.000000e+00> : vector<128xf32>
    %13 = vector.multi_reduction <add>, %5, %cst_12 [0] : vector<2x128xf32> to vector<128xf32>
    %14 = vector.shape_cast %13 : vector<128xf32> to vector<1x128xf32>
    %c2_i32_13 = arith.constant 2 : i32
    %15 = arith.muli %c2_i32_13, %arg2 : i32
    %c1_i32 = arith.constant 1 : i32
    %16 = arith.addi %15, %c1_i32 : i32
    %c0_14 = arith.constant 0 : index
    %c0_15 = arith.constant 0 : index
    %17 = arith.index_cast %16 : i32 to index
    %c0_16 = arith.constant 0 : index
    %18 = vector.load %arg5[%c0_14, %c0_15, %17, %c0_16] : memref<1x1x4x128xf32, #tpu.memory_space<vmem>>, vector<1x1x1x128xf32>
    %19 = vector.shape_cast %18 : vector<1x1x1x128xf32> to vector<1x128xf32>
    %20 = vector.shape_cast %14 : vector<1x128xf32> to vector<1x1x1x128xf32>
    tpu.vector_store %arg5[%c0_14, %c0_15, %17, %c0_16], %20 {strides = array<i32>} : memref<1x1x4x128xf32, #tpu.memory_space<vmem>>, vector<1x1x1x128xf32>,
    return
  }
  func.func @transform_0(%arg0: i32, %arg1: i32, %arg2: i32) -> (i32, i32, i32, i32) {
    %c0_i32 = arith.constant 0 : i32
    %c0_i32_0 = arith.constant 0 : i32
    %c0_i32_1 = arith.constant 0 : i32
    return %arg0, %c0_i32, %arg1, %c0_i32_0 : i32, i32, i32, i32
  }
  func.func @transform_1(%arg0: i32, %arg1: i32, %arg2: i32) -> (i32, i32, i32, i32, i32) {
    %c0_i32 = arith.constant 0 : i32
    %c0_i32_0 = arith.constant 0 : i32
    %c0_i32_1 = arith.constant 0 : i32
    return %arg0, %arg2, %c0_i32, %arg1, %c0_i32_0 : i32, i32, i32, i32, i32
  }
  func.func @transform_2(%arg0: i32, %arg1: i32, %arg2: i32) -> (i32, i32, i32, i32) {
    %c0_i32 = arith.constant 0 : i32
    %c0_i32_0 = arith.constant 0 : i32
    %c0_i32_1 = arith.constant 0 : i32
    return %arg0, %arg1, %c0_i32, %c0_i32_0 : i32, i32, i32, i32
  }
}

</mosaic_0001>

<bundles_post_ra>
// kernel: tpu_custom_call.1
= control target key start
LH: loop header
LB: loop body
LE: loop exit
PB: predicated region body
PF: predicated region fallthrough
CT: control target
= control target key end

     0   :  { %s969_s0 = inlined_call_operand.hbm [shape: f32[2,1,2,128], index: 0, kind: input, shape index: {}]   ;;  %s970_s1 = inlined_call_operand.hbm [shape: f32[2,2,4,2,128], index: 1, kind: input, shape index: {}]   ;;  %s971_s2 = inlined_call_operand.hbm [shape: f32[2,1,4,128], index: 2, kind: output, shape index: {}]  }
   0x1   :  { %981 = sst [smem:[#allocation17_spill]] %s969_s0 }
   0x2   :  { %7 = vsyncpa [#allocation3], 0 }
   0x3   :  { %9 = vsyncpa [#allocation3 + $0x1], 0 }
   0x4   :  { %10 = vsyncpa [#allocation6], 0 }
   0x5   :  { %12 = vsyncpa [#allocation6 + $0x1], 0 }
   0x6   :  { %13 = vsyncpa [#allocation4], 0 }
   0x7   :  { %15 = vsyncpa [#allocation4 + $0x1], 0  ;;  %s729_s9 = smov 0   ;;  %s731_s10 = smov 0  }
   0x8   :  { %s733_s11 = smov 0   ;;  %s735_s12 = smov 0  }
   0x9   :  { %s737_s13 = smov 0   ;;  %s739_s14 = smov 0  }
   0xa   :  { %s741_s15 = smov 0   ;;  %s743_s16 = smov 0  }
   0xb   :  { %s745_s17 = smov 0   ;;  %s747_s18 = smov 0  }
   0xc   :  { %s749_s19 = smov 0  }
   0xd LB: > { %982 = sst [smem:[#allocation11_spill]] %s679_s12  ;;  %s397_s20 = sadd.s32 4294967295, %s707_s19   ;;  %s707_s19 = sphi %s749_s19, %s21_s19   ;;  %s703_s18 = sphi %s747_s18, %s1007_s18   ;;  %s699_s17 = sphi %s745_s17, %s1015_s17   ;;  %s695_s16 = sphi %s743_s16, %s1005_s16   ;;  %s691_s15 = sphi %s741_s15, %s1014_s15   ;;  %s687_s14 = sphi %s739_s14, %s1013_s14   ;;  %s683_s13 = sphi %s737_s13, %s1012_s13   ;;  %s679_s12 = sphi %s735_s12, %s1011_s12   ;;  %s675_s11 = sphi %s733_s11, %s1010_s11   ;;  %s671_s10 = sphi %s731_s10, %s1009_s10   ;;  %s667_s9 = sphi %s729_s9, %s1008_s9  }
   0xe   : > { %983 = sst [smem:[#allocation12_spill]] %s703_s18  ;;  %s398_s21 = sadd.s32 4294967294, %s707_s19  }
   0xf   : > { %984 = sst [smem:[#allocation13_spill]] %s707_s19  ;;  %s40_s22 = sadd.s32 1, %s703_s18 }
  0x10   : > { %p56_p0 = scmp.ne.s32.totalorder %s687_s14, %s683_s13  ;;  %p57_p1 = scmp.eq.s32.totalorder %s707_s19, 0 }
  0x11   : > { %p62_p2 = scmp.ne.s32.totalorder %s683_s13, %s679_s12  ;;  %p63_p3 = scmp.eq.s32.totalorder %s397_s20, 0 }
  0x12   : > { %p791_p4 = por %p57_p1, %p56_p0  ;;  %p86_p5 = scmp.ne.s32.totalorder %s675_s11, %s671_s10 }
  0x13   : > { %p797_p6 = por %p63_p3, %p62_p2  ;;  %p92_p7 = scmp.ne.s32.totalorder %s671_s10, %s667_s9 }
  0x14   : > { %p802_p8 = por %p86_p5, %p57_p1  ;;  %p118_p9 = scmp.eq.s32.totalorder %s397_s20, 3 }
  0x15   : > { %p806_p10 = por %p92_p7, %p63_p3  ;;  %p124_p11 = scmp.eq.s32.totalorder %s398_s21, 3 }
  0x16   : > { %p810_p12 = por %p118_p9, %p56_p0  ;;  %p435_p1 = scmp.lt.s32.totalorder %s707_s19, 4 }
  0x17   : > { %s988_s27 = scalar_select %p806_p10, 1, 0 }
  0x18   : > { %s989_s28 = scalar_select %p810_p12, 1, 0 }
  0x19   : > { %p814_p13 = por %p124_p11, %p62_p2  ;;  %s144_s30 = sand.u32 1, %s687_s14  }
  0x1a   : > { %s402_s3 = sshll.u32 %s703_s18, 5  ;;  %s401_s4 = sshll.u32 %s144_s30, 1 }
  0x1b   : > { %s990_s29 = scalar_select %p814_p13, 1, 0 }
  0x1c   : > { %s992_s0 = sld [smem:[#allocation17_spill]]  ;;  %s148_s8 = scalar_lea.vmem [#allocation2], %s401_s4 }
  0x1d   : > { %991 = sst [smem:[#allocation14_spill]] %s990_s29  ;;  %s156_s9 = sshll.u32 %s148_s8, 4  ;;  %s157_s9 = int_to_ptr.vmem [resolvable:$true] %s156_s9 }
  0x1e   : > { %p826_p3 = pnand %p435_p1, %p791_p4  ;;  %p832_p0 = pnand %p435_p1, %p802_p8 }
  0x1f   : > { %p407_p2 = scmp.ge.s32.totalorder %s707_s19, 1  ;;  %s145_s23 = scalar_lea.sflag [#allocation3], %s144_s30 }
  0x20   : > { %p529_p5 = pneg %p826_p3  ;;  %s540_s5 = scalar_lea.vmem %s157_s9, 32 }
  0x21   : > { %p541_p7 = scmp.ne.s32.totalorder %s157_s9, %s540_s5  ;;  %s709_s24 = smov [#allocation2]  }
  0x22   : > { %s154_s7 = scalar_lea.hbm %s992_s0, %s402_s3  ;;  %s545_s3 = sshll.u32 %s709_s24, 4  ;;  %s546_s3 = int_to_ptr.vmem [resolvable:$false] %s545_s3 }
  0x23   : > { %p543_p9 = pnand %p541_p7, %p529_p5  ;;  %s547_s4 = scalar_lea.vmem %s546_s3, 64 }
  0x24   : > { %p548_p4 = scmp.lt.s32.totalorder %s157_s9, %s546_s3  ;;  %p549_p13 = scmp.lt.s32.totalorder %s547_s4, %s540_s5 }
  0x25   : > { %p544_p11 = pneg %p543_p9 }
  0x26   : > { %p550_p12 = por %p549_p13, %p548_p4 }
  0x28   : > { %p551_p10 = pnand %p550_p12, %p544_p11 }
  0x2a   : > { %554 = shalt.err (!%p551_p10)
}
  0x2b   : > { %427 = dma.hbm_to_vmem [thread:$0]  (!%p826_p3), %s154_s7, 32, %s157_s9, %s145_s23  }
  0x2c   : > { %p185_p8 = scmp.lt.s32.totalorder %s707_s19, 5  ;;  %s79_s26 = sadd.s32 1, %s675_s11 }
  0x2d   : > { %s33_s6 = sadd.s32 1, %s699_s17  ;;  %s163_s8 = sand.u32 1, %s675_s11  }
  0x2e   : > { %p845_p1 = pnand %p407_p2, %p185_p8  ;;  %p34_p10 = scmp.ge.s32.totalorder %s33_s6, 2 }
  0x2f   : > { %s403_s20 = sshll.u32 %s163_s8, 3  ;;  %s404_s5 = sshll.u32 %s699_s17, 2 }
  0x30   : > { %s1017_s6 = smov (%p34_p10, %s33_s6), 0  ;;  %s1019_s22 = smov (!%p34_p10, %s40_s22), %s703_s18 }
  0x31   : > { %996 = sst [smem:[#allocation15_spill]] %s1017_s6  ;;  %s73_s23 = ssub.s32 %s699_s17, %s1017_s6 }
  0x32   : > { %p42_p12 = scmp.ge.s32.totalorder %s1019_s22, 2  ;;  %s405_s7 = sshll.u32 %s703_s18, 3 }
  0x33   : > { %s174_s9 = sadd.s32 %s405_s7, %s404_s5  ;;  %s167_s24 = scalar_lea.vmem [#allocation5], %s403_s20 }
  0x34   : > { %s177_s3 = sshll.u32 %s167_s24, 4  ;;  %s1021_s22 = smov (%p42_p12, %s1019_s22), 0  ;;  %s862_s3 = int_to_ptr.vmem [resolvable:$true] %s177_s3 }
  0x35   : > { %997 = sst [smem:[#allocation16_spill]] %s1021_s22  ;;  %s406_s4 = sshll.u32 %s174_s9, 5 }
  0x36   : > { %s44_s0 = ssub.s32 %s703_s18, %s1021_s22  ;;  %s176_s19 = scalar_lea.hbm %s970_s1, %s406_s4 }
  0x37   : > { %p47_p13 = scmp.eq.s32.totalorder %s44_s0, 0  ;;  %s74_s6 = sor.u32 %s73_s23, %s44_s0 }
  0x38   : > { %p77_p3 = scmp.eq.s32.totalorder %s74_s6, 0  ;;  %s998_s5 = sadd.s32 1, %s687_s14 }
  0x39   : > { %s872_s20 = scalar_select %p47_p13, %s687_s14, %s998_s5  }
  0x3a   : > { %s875_s7 = scalar_select %p77_p3, %s675_s11, %s79_s26  }
  0x3b   : > { %s164_s24 = scalar_lea.sflag [#allocation6], %s163_s8  ;;  %p557_p2 = pneg %p832_p0 }
  0x3c   : > { %s568_s9 = scalar_lea.vmem %s862_s3, 128  ;;  %s710_s22 = smov [#allocation5]  }
  0x3d   : > { %p569_p5 = scmp.ne.s32.totalorder %s862_s3, %s568_s9  ;;  %s573_s18 = sshll.u32 %s710_s22, 4  ;;  %s574_s18 = int_to_ptr.vmem [resolvable:$false] %s573_s18 }
  0x3e   : > { %s575_s12 = scalar_lea.vmem %s574_s18, 256  ;;  %p576_p11 = scmp.lt.s32.totalorder %s862_s3, %s574_s18 }
  0x3f   : > { %p571_p7 = pnand %p569_p5, %p557_p2  ;;  %p577_p4 = scmp.lt.s32.totalorder %s575_s12, %s568_s9 }
  0x41   : > { %p572_p9 = pneg %p571_p7  ;;  %p578_p8 = por %p577_p4, %p576_p11 }
  0x43   : > { %p579_p10 = pnand %p578_p8, %p572_p9 }
  0x45   : > { %582 = shalt.err (!%p579_p10)
}
  0x46   : > { %s711_s0 = smov 32   ;;  %s712_s29 = smov 2  }
  0x47   : > { %430 = dma.hbm_to_vmem [thread:$0]  (!%p832_p0), %s176_s19, 128, %s862_s3, %s164_s24, %s711_s0, %s711_s0, %s712_s29  }
  0x48   : > { %189 = sbr.rel (%p845_p1) target bundleno = 118 (0x76), region = 28  ;;  %s888_s26 = sand.u32 (!%p845_p1), 1, %s683_s13  }
  0x49   : > { %s408_s18 = sshll.u32 (!%p845_p1), %s888_s26, 1  ;;  %s192_s22 = scalar_lea.sflag (!%p845_p1), [#allocation3], %s888_s26 }
  0x4a   : > { %s195_s6 = scalar_lea.vmem (!%p845_p1), [#allocation2], %s408_s18 }
  0x4d   : > { %654 = dma.done.wait (%p797_p6), %s192_s22, 32  }
  0x4e   : > { %656 = vsyncadd (%p797_p6), %s192_s22, 4294967264  ;;  %s200_s19 = sand.u32 1, %s671_s10   ;;  %p999_p0 = scmp.ne.s32.totalorder %s988_s27, 0 }
  0x4f   : > { %s409_s21 = sshll.u32 %s200_s19, 3  ;;  %s201_s30 = scalar_lea.sflag [#allocation6], %s200_s19 }
  0x50   : > { %s204_s8 = scalar_lea.vmem [#allocation5], %s409_s21 }
  0x51   : > { %658 = dma.done.wait (%p999_p0), %s201_s30, 128  }
  0x52   : > { %660 = vsyncadd (%p999_p0), %s201_s30, 4294967168  ;;  %vm234_vm0 = vcmask 1041408   ;;  %v230_v0 = vld [vmem:[%s204_s8] sm:$0x3]  ;;  %v231_v1 = vld [vmem:[%s204_s8 + $0x2] sm:$0x3] }
  0x53   : > { %v232_v2 = vld [vmem:[%s204_s8 + $0x4] sm:$0x3]  ;;  %v233_v3 = vld [vmem:[%s204_s8 + $0x6] sm:$0x3]  ;;  %v235_v4 = vsel %vm234_vm0, %v230_v0, 0.0  ;;  %v236_v5 = vsel %vm234_vm0, %v231_v1, 0.0 }
  0x54   : > { %v238_v6 = vsel %vm234_vm0, %v232_v2, 0.0  ;;  %v237_v7 = vadd.f32 %v236_v5, %v235_v4  ;;  %v240_v8 = vsel %vm234_vm0, %v233_v3, 0.0  ;;  %v242_v10 = vld [vmem:[%s195_s6] sm:$0x3]  ;;  %s410_s25 = sshll.u32 %s888_s26, 2  ;;  %s411_s27 = sshll.u32 %s691_s15, 1 }
  0x55   : > { %s229_s23 = scalar_lea.vmem [#allocation7], %s410_s25  ;;  %s415_s5 = sshll.u32 %s695_s16, 6 }
  0x56   : > { %v239_v9 = vadd.f32 %v238_v6, %v237_v7  ;;  %s252_s3 = scalar_lea.vmem %s229_s23, %s411_s27 [#allocation7]  ;;  %s279_s4 = sshll.u32 %s229_s23, 4  ;;  %s910_s4 = int_to_ptr.vmem [resolvable:$true] %s279_s4 }
  0x57   : > { %s277_s9 = scalar_lea.hbm %s971_s2, %s415_s5  ;;  %s265_s12 = scalar_lea.sflag [#allocation4], %s888_s26 }
  0x58   : > { %v241_v11 = vadd.f32 %v240_v8, %v239_v9  ;;  %s583_s0 = scalar_lea.vmem %s910_s4, 64  ;;  %p1000_p1 = scmp.ne.s32.totalorder %s989_s28, 0 }
  0x59   : > { %p584_p6 = scmp.ne.s32.totalorder %s910_s4, %s583_s0  ;;  %s713_s16 = smov [#allocation7]  }
  0x5a   : > { %v244_v12 = vsel %vm234_vm0, %v241_v11, 0.0  ;;  %v243_v13 = vmul.f32 %v242_v10, %v241_v11  ;;  %s587_s29 = sshll.u32 %s713_s16, 4  ;;  %s588_s29 = int_to_ptr.vmem [resolvable:$false] %s587_s29 }
  0x5b   : > { %v245_v14 = vrot.slane %v244_v12, 4  ;;  %p585_p12 = pnand %p584_p6, %p1000_p1  ;;  %s589_s18 = scalar_lea.vmem %s588_s29, 128 }
  0x5c   : > { %v254_v15 = vsel %vm234_vm0, %v243_v13, 0.0  ;;  %p590_p3 = scmp.lt.s32.totalorder %s910_s4, %s588_s29  ;;  %p591_p2 = scmp.lt.s32.totalorder %s589_s18, %s583_s0 }
  0x5d   : > { %v246_v16 = vadd.f32 %v245_v14, %v244_v12  ;;  %v255_v17 = vrot.slane %v254_v15, 4  ;;  %p586_p13 = pneg %p585_p12 }
  0x5e   : > { %p592_p5 = por %p591_p2, %p590_p3 }
  0x5f   : > { %v247_v18 = vrot.slane %v246_v16, 2  ;;  %v256_v19 = vadd.f32 %v255_v17, %v254_v15 }
  0x60   : > { %p593_p7 = pnand %p592_p5, %p586_p13 }
  0x61   : > { %v248_v20 = vadd.f32 %v247_v18, %v246_v16  ;;  %v257_v21 = vrot.slane %v256_v19, 2 }
  0x63   : > { %v249_v22 = vrot.slane %v248_v20, 1  ;;  %v258_v23 = vadd.f32 %v257_v21, %v256_v19 }
  0x65   : > { %v250_v24 = vadd.f32 %v249_v22, %v248_v20  ;;  %v259_v25 = vrot.slane %v258_v23, 1 }
  0x67   : > { %253 = vst [vmem:[%s252_s3] sm:$0x1] %v250_v24  ;;  %v260_v26 = vadd.f32 %v259_v25, %v258_v23 }
  0x69   : > { %413 = vst [vmem:[%s252_s3 + $0x1] sm:$0x1] %v260_v26 }
  0x6a   : > { %596 = shalt.err (!%p593_p7)
}
  0x6b   : > { %s597_s22 = scalar_lea.hbm %s277_s9, 64  ;;  %s601_s19 = scalar_lea.hbm %s971_s2, 128 }
  0x6c   : > { %p598_p9 = scmp.ne.s32.totalorder %s277_s9, %s597_s22  ;;  %p602_p8 = scmp.lt.s32.totalorder %s277_s9, %s971_s2 }
  0x6d   : > { %p603_p10 = scmp.lt.s32.totalorder %s601_s19, %s597_s22 }
  0x6e   : > { %p599_p11 = pnand %p598_p9, %p1000_p1 }
  0x6f   : > { %p604_p0 = por %p603_p10, %p602_p8 }
  0x70   : > { %p600_p4 = pneg %p599_p11 }
  0x72   : > { %p605_p6 = pnand %p604_p0, %p600_p4 }
  0x74   : > { %608 = shalt.err (!%p605_p6)
}
  0x75   : > { %422 = dma.vmem_to_hbm [thread:$0]  (%p1000_p1), %s910_s4, 64, %s277_s9, %s265_s12  }
  0x76 PF: > { %s1001_s8 = sld [smem:[#allocation13_spill]] }
  0x77   : > { %s1002_s25 = sld [smem:[#allocation11_spill]] }
  0x78   : > { %s1003_s27 = sld [smem:[#allocation14_spill]] }
  0x7c   : > { %p436_p12 = scmp.ge.s32.totalorder %s1001_s8, 2 }
  0x7d   : > { %s291_s23 = sand.u32 1, %s1002_s25  }
  0x7e   : > { %p1004_p13 = scmp.ne.s32.totalorder %s1003_s27, 0  ;;  %s292_s3 = scalar_lea.sflag [#allocation4], %s291_s23 }
  0x80   : > { %p432_p3 = pnand %p436_p12, %p1004_p13 }
  0x82   : > { %p433_p2 = pneg %p432_p3 }
  0x84   : > { %662 = dma.done.wait (%p433_p2), %s292_s3, 64  }
  0x85   : > { %664 = vsyncadd (%p433_p2), %s292_s3, 4294967232  ;;  %s21_s19 = sadd.s32 1, %s1001_s8   ;;  %s1005_s16 = sld [smem:[#allocation12_spill]] }
  0x86   : > { %p18_p5 = scmp.ge.s32.totalorder %s21_s19, 6   ;;  %s1006_s28 = sld [smem:[#allocation15_spill]] }
  0x87   : > { %s1007_s18 = sld [smem:[#allocation16_spill]]  ;;  %s1008_s9 = smov %s671_s10 }
  0x88   : > { %s1009_s10 = smov %s675_s11  ;;  %s1010_s11 = smov %s875_s7 }
  0x89   : > { %s1011_s12 = smov %s683_s13  ;;  %s1012_s13 = smov %s687_s14 }
  0x8a   : > { %s1013_s14 = smov %s872_s20  ;;  %s1014_s15 = smov %s699_s17 }
  0x8b   :  { %20 = sbr.rel (!%p18_p5) target bundleno = 13 (0xd), region = 88 }
  0x8c   : > { %s1015_s17 = smov %s1006_s28 }
  0x90   :  { %297 = vsyncpa [#allocation3], 1 }
  0x91   :  { %299 = vsyncpa [#allocation3 + $0x1], 1 }
  0x92   :  { %300 = vsyncpa [#allocation6], 1 }
  0x93   :  { %302 = vsyncpa [#allocation6 + $0x1], 1 }
  0x94   :  { %303 = vsyncpa [#allocation4], 1 }
  0x95   :  { %305 = vsyncpa [#allocation4 + $0x1], 1 }

</bundles_post_ra>
